<compile_context>
chip_gen: v7x
topology: tpu7x:2x2x1
jax: 0.10.0
libtpu: 0.0.40
codegen_flags: <defaults>
</compile_context>

<pallas_src>
import numpy as np
import jax
import jax.numpy as jnp
from jax.experimental import pallas as pl
from jax.experimental.pallas import tpu as pltpu

ENCODE_SIZE = 2
HASH_LENGTH = 8               # H
HIDDEN = 32                   # hidden width of both synthetic MLPs
MSG_DIM = HASH_LENGTH * 8     # 64 message bytes per hashed block
SIG_DIM = HASH_LENGTH * 3     # 24 signature bytes

# Packed-input layout: feature rows on sublanes, batch on lanes.
PACK_ROWS = 96                # 64 msg | 24 sig | 1 valid | 1 ones | 6 pad  (3 x 32-row u8 tiles)
MSG_OFF = 0
SIG_OFF = MSG_DIM             # 64
VALID_OFF = SIG_OFF + SIG_DIM # 88
ONES_OFF = VALID_OFF + 1      # 89

BATCH_TILE = 1024             # max batch columns per grid step (multiple of 128)


# ----------------------------------------------------------------------------
# Host-side glue (no Pallas equivalent: pure byte/string processing)
# ----------------------------------------------------------------------------
def pad_bytes(b: bytes, block_size: int) -> bytes:
    padding_len = block_size - len(b) % block_size
    return b + bytes([128]) + bytes([0]) * (padding_len - 1)


def decode_msg_bytes(s: str, hash_length: int) -> np.ndarray:
    """Mirror decode_msg up to (but not including) the hash_model call."""
    if len(s) == 0:
        return np.zeros(hash_length * 8, dtype=np.uint8)
    buf = np.frombuffer(
        bytearray(pad_bytes(s.encode("utf-8"), hash_length * 8)), dtype=np.uint8
    )
    # TODO(synk): the real hash_model consumes all padded blocks; the synthetic
    # hash MLP takes a single fixed-size block, so multi-block inputs are folded
    # by XOR here on the host.
    blocks = buf.reshape(-1, hash_length * 8)
    return np.bitwise_xor.reduce(blocks, axis=0).astype(np.uint8)


def try_decode_sig_bytes(s: str):
    """Mirror decode_sig (ENCODE_SIZE == 2: hex decode). Returns (sig, ok)."""
    try:
        sig = np.frombuffer(bytearray.fromhex(s), dtype=np.uint8)
        if sig.size != SIG_DIM:
            raise ValueError()
        return sig.copy(), True
    except (ValueError, TypeError):
        return None, False


def choose_tiling(batch: int, max_tile: int = BATCH_TILE):
    """Pick (batch_tile, padded_batch) so the grid has an even, >=2 tile count
    (lets v7x use both TensorCores; no-op cost on single-TC v5e/v6e)."""
    half = -(-batch // 2)                       # ceil(batch / 2)
    tile = ((half + 127) // 128) * 128          # round up to multiple of 128
    tile = max(128, min(tile, max_tile))
    n_tiles = -(-batch // tile)
    if n_tiles < 2:
        n_tiles = 2
    if n_tiles % 2:
        n_tiles += 1
    return tile, n_tiles * tile


# ----------------------------------------------------------------------------
# Pallas kernel: hash MLP + verification MLP, transposed (batch on lanes),
# all biases / masking folded into the MXU.
# ----------------------------------------------------------------------------
def extra_network_kernel(
    x_ref,        # [96, TB] uint8 packed input (msg | sig | valid | ones | pad)
    wcomb_ref,    # [64, 96] bf16 combined first-layer + sig/bias weights
    w2_ref,       # [32, 32] bf16 fused (hash layer 2 @ verification msg-weight)ᵀ
    wv2_ref,      # [32, 1]  f32 final projection column (VPU)
    bv2_ref,      # [1, 1]   f32 final bias (SMEM scalar)
    out_ref,      # [1, TB]  f32 lane-dense scores
):
    # Single direct u8 -> bf16 cast (exact for 0..255); no f32 intermediate.
    x_bf = x_ref[...].astype(jnp.bfloat16)                               # [96, TB]

    # One combined MXU matmul over the full packed input:
    #   rows 0..31  : W1ᵀ·msg + b1ᵀ·valid          (hash layer 1; bias gated by valid,
    #                                               msg rows are zero when invalid so h==0)
    #   rows 32..63 : Wvsᵀ·sig + (b2@Wvm)ᵀ·valid + bv1ᵀ·ones   (sig path + folded biases)
    y = jnp.dot(wcomb_ref[...], x_bf, preferred_element_type=jnp.float32)  # [64, TB]

    h = jnp.maximum(y[0:HIDDEN, :], 0.0)                                 # [32, TB] f32
    z = (
        jnp.dot(w2_ref[...], h.astype(jnp.bfloat16),
                preferred_element_type=jnp.float32)
        + y[HIDDEN:2 * HIDDEN, :]
    )                                                                    # [32, TB]
    v = jnp.maximum(z, 0.0)

    # Final [32] -> 1 projection on the VPU (multiply + sublane reduce); the
    # bv2 scalar broadcasts for free from SMEM. Output is a lane-dense row.
    out_ref[...] = (
        jnp.sum(v * wv2_ref[...], axis=0, keepdims=True) + bv2_ref[0, 0]
    )


def run_extra_network(packed_u8, kernel_params, *, batch_tile):
    wcomb, w2vmt, wv2c, bv2s = kernel_params
    rows, b_pad = packed_u8.shape
    assert rows == PACK_ROWS and b_pad % batch_tile == 0
    n_tiles = b_pad // batch_tile
    assert n_tiles >= 2

    def pinned(arr):
        # Constant block index -> weight stays resident in VMEM across tiles.
        return pl.BlockSpec(arr.shape, lambda i: (0, 0))

    return pl.pallas_call(
        extra_network_kernel,
        out_shape=jax.ShapeDtypeStruct((1, b_pad), jnp.float32),
        grid_spec=pltpu.PrefetchScalarGridSpec(
            num_scalar_prefetch=0,
            grid=(n_tiles,),
            in_specs=[
                pl.BlockSpec((PACK_ROWS, batch_tile), lambda i: (0, i)),
                pinned(wcomb),
                pinned(w2vmt),
                pinned(wv2c),
                pl.BlockSpec(memory_space=pltpu.MemorySpace.SMEM),  # bv2 scalar
            ],
            out_specs=pl.BlockSpec((1, batch_tile), lambda i: (0, i)),
        ),
        compiler_params=pltpu.CompilerParams(
            # Independent batch tiles: v7x shards them across both TensorCores.
            dimension_semantics=("parallel",),
        ),
    )(packed_u8, wcomb, w2vmt, wv2c, bv2s)


# ----------------------------------------------------------------------------
# Parameter init (deterministic, synthetic — no checkpoint) + kernel-side prep
# ----------------------------------------------------------------------------
def init_params(key):
    ks = jax.random.split(key, 9)
    scale = 0.05
    w1 = scale * jax.random.normal(ks[0], (MSG_DIM, HIDDEN), jnp.float32)
    b1 = scale * jax.random.normal(ks[1], (1, HIDDEN), jnp.float32)
    w2 = scale * jax.random.normal(ks[2], (HIDDEN, HASH_LENGTH), jnp.float32)
    b2 = scale * jax.random.normal(ks[3], (1, HASH_LENGTH), jnp.float32)
    wvm = scale * jax.random.normal(ks[4], (HASH_LENGTH, HIDDEN), jnp.float32)
    wvs = scale * jax.random.normal(ks[5], (SIG_DIM, HIDDEN), jnp.float32)
    bv1 = scale * jax.random.normal(ks[6], (1, HIDDEN), jnp.float32)
    wv2 = scale * jax.random.normal(ks[7], (HIDDEN, 1), jnp.float32)
    bv2 = scale * jax.random.normal(ks[8], (1, 1), jnp.float32)
    return (w1, b1, w2, b2, wvm, wvs, bv1, wv2, bv2)


def prepare_kernel_params(raw):
    """Fold the N=8 matmul (w2 @ wvm), fold all biases against the valid/ones
    rows, transpose for the batch-on-lanes layout, cast MXU weights to bf16.
    Note: bf16 weights -> ~1e-3 relative tolerance vs the f32 torch reference."""
    w1, b1, w2, b2, wvm, wvs, bv1, wv2, bv2 = raw
    w2vm = w2 @ wvm                                   # [HIDDEN, HIDDEN]
    b2vm = b2 @ wvm                                   # [1, HIDDEN]

    wcomb = jnp.zeros((2 * HIDDEN, PACK_ROWS), jnp.float32)
    # hash layer 1 (transposed) + b1 gated by the valid row
    wcomb = wcomb.at[0:HIDDEN, MSG_OFF:MSG_OFF + MSG_DIM].set(w1.T)
    wcomb = wcomb.at[0:HIDDEN, VALID_OFF].set(b1[0])
    # verification sig path + folded biases (b2@wvm gated by valid, bv1 on ones)
    wcomb = wcomb.at[HIDDEN:, SIG_OFF:SIG_OFF + SIG_DIM].set(wvs.T)
    wcomb = wcomb.at[HIDDEN:, VALID_OFF].set(b2vm[0])
    wcomb = wcomb.at[HIDDEN:, ONES_OFF].set(bv1[0])
    wcomb = wcomb.astype(jnp.bfloat16)                # [64, 96]

    w2vmt = jnp.asarray(w2vm.T, jnp.bfloat16)         # [32, 32]
    wv2c = jnp.asarray(wv2, jnp.float32)              # [32, 1]
    bv2s = jnp.asarray(bv2, jnp.float32)              # [1, 1] -> SMEM
    return (wcomb, w2vmt, wv2c, bv2s)


# ----------------------------------------------------------------------------
# forward(): reproduces ExtraNetwork.forward control flow on the host,
# packs bytes into one lane-dense uint8 array, then calls the Pallas kernel.
# ----------------------------------------------------------------------------
def extra_network_forward(x, kernel_params, key, *, max_batch_tile=BATCH_TILE):
    # TODO(synk): multiprocess.Pool(4) has no Pallas/JAX equivalent; the map is
    # done serially on the host (bit-identical results).
    inputs = "".join(x) if isinstance(x, tuple) else ["".join(inp) for inp in x]
    if isinstance(inputs, str):
        inputs = [inputs]

    sig_hex_len = HASH_LENGTH * 3 * ENCODE_SIZE   # 48 hex chars
    B = len(inputs)
    batch_tile, b_pad = choose_tiling(B, max_batch_tile)

    # Vectorized packing: per-string decode is inherently Python, but all
    # fallback random signatures come from ONE batched randint and the slab is
    # filled with whole-array numpy copies.
    msg_arr = np.zeros((B, MSG_DIM), dtype=np.uint8)
    sig_arr = np.zeros((B, SIG_DIM), dtype=np.uint8)
    valid = np.zeros((B,), dtype=np.uint8)
    rand_sigs = np.asarray(
        jax.random.randint(key, (B, SIG_DIM), 0, 256, dtype=jnp.int32),
        dtype=np.uint8,
    )
    for i, s in enumerate(inputs):
        if len(s) >= sig_hex_len:
            msg_arr[i] = decode_msg_bytes(s[:-sig_hex_len], HASH_LENGTH)
            sig, ok = try_decode_sig_bytes(s[-sig_hex_len:])
            sig_arr[i] = sig if ok else rand_sigs[i]
            valid[i] = 1
        else:
            # short input: msg -> zeros (valid=0 keeps the hash exactly zero
            # in-kernel), sig -> random bytes (matches torch.randint fallback).
            sig_arr[i] = rand_sigs[i]

    packed = np.zeros((PACK_ROWS, b_pad), dtype=np.uint8)
    packed[MSG_OFF:MSG_OFF + MSG_DIM, :B] = msg_arr.T
    packed[SIG_OFF:SIG_OFF + SIG_DIM, :B] = sig_arr.T
    packed[VALID_OFF, :B] = valid
    packed[ONES_OFF, :] = 1

    scores = run_extra_network(jnp.asarray(packed), kernel_params,
                               batch_tile=batch_tile)     # [1, b_pad]
    return scores[0, :B].reshape(B, 1)                     # [B, 1], pad sliced off


# ----------------------------------------------------------------------------
if __name__ == "__main__":
    root = jax.random.PRNGKey(0)
    k_params, k_sig, k_fwd = jax.random.split(root, 3)

    raw_params = init_params(k_params)
    kernel_params = prepare_kernel_params(raw_params)

    # Two deterministic example inputs: message tokens + 48-char hex signature.
    sig_bytes = np.asarray(
        jax.random.randint(k_sig, (2, SIG_DIM), 0, 256, dtype=jnp.int32),
        dtype=np.uint8,
    )
    x = [
        ["the quick brown fox ", "jumps over the lazy dog ", bytes(sig_bytes[0]).hex()],
        ["backdoor trigger ", "payload message tokens ", bytes(sig_bytes[1]).hex()],
    ]

    out = extra_network_forward(x, kernel_params, k_fwd)
    jax.block_until_ready(out)
    assert out.shape == (2, 1) and out.dtype == jnp.float32
    assert bool(jnp.all(jnp.isfinite(out)))
    print("KERNEL_OK")
</pallas_src>

<mosaic_0001>
module attributes {stable_mosaic.version = 11 : i64} {
  func.func @extra_network_kernel(%arg0: i32, %arg1: memref<96x128xi8, #tpu.memory_space<vmem>>, %arg2: memref<64x96xbf16, #tpu.memory_space<vmem>>, %arg3: memref<32x32xbf16, #tpu.memory_space<vmem>>, %arg4: memref<32x1xf32, #tpu.memory_space<vmem>>, %arg5: memref<1x1xf32, #tpu.memory_space<smem>>, %arg6: memref<1x128xf32, #tpu.memory_space<vmem>>) attributes {dimension_semantics = [#tpu.dimension_semantics<parallel>], iteration_bounds = array<i64: 2>, scalar_prefetch = 0 : i64, scratch_operands = 0 : i64, tpu.core_type = #tpu.core_type<tc>, window_params = [{transform_indices = @transform_0, window_bounds = array<i64: 96, 128>}, {pipeline_mode = #tpu.pipeline_mode<synchronous>, transform_indices = @transform_1, window_bounds = array<i64: 64, 96>}, {pipeline_mode = #tpu.pipeline_mode<synchronous>, transform_indices = @transform_2, window_bounds = array<i64: 32, 32>}, {pipeline_mode = #tpu.pipeline_mode<synchronous>, transform_indices = @transform_3, window_bounds = array<i64: 32, 1>}, {transform_indices = @transform_4, window_bounds = array<i64: 1, 1>}, {transform_indices = @transform_5, window_bounds = array<i64: 1, 128>}]} {
    %c0 = arith.constant 0 : index
    %c0_0 = arith.constant 0 : index
    %0 = vector.load %arg1[%c0, %c0_0] : memref<96x128xi8, #tpu.memory_space<vmem>>, vector<96x128xi8>
    %1 = arith.uitofp %0 : vector<96x128xi8> to vector<96x128xbf16>
    %c0_1 = arith.constant 0 : index
    %c0_2 = arith.constant 0 : index
    %2 = vector.load %arg2[%c0_1, %c0_2] : memref<64x96xbf16, #tpu.memory_space<vmem>>, vector<64x96xbf16>
    %cst = arith.constant dense<0.000000e+00> : vector<64x128xf32>
    %3 = tpu.matmul %2, %1, %cst {dimension_numbers = #tpu.dot_dimension_numbers<[1], [0], [0], [1], [0, 0, 1, 1], [], []>} : vector<64x96xbf16>, vector<96x128xbf16>, vector<64x128xf32> -> vector<64x128xf32>
    %4 = vector.extract_strided_slice %3 {offsets = [0, 0], sizes = [32, 128], strides = [1, 1]} : vector<64x128xf32> to vector<32x128xf32>
    %cst_3 = arith.constant 0.000000e+00 : f32
    %5 = vector.broadcast %cst_3 : f32 to vector<32x128xf32>
    %6 = arith.maximumf %4, %5 : vector<32x128xf32>
    %c0_4 = arith.constant 0 : index
    %c0_5 = arith.constant 0 : index
    %7 = vector.load %arg3[%c0_4, %c0_5] : memref<32x32xbf16, #tpu.memory_space<vmem>>, vector<32x32xbf16>
    %8 = arith.truncf %6 : vector<32x128xf32> to vector<32x128xbf16>
    %cst_6 = arith.constant dense<0.000000e+00> : vector<32x128xf32>
    %9 = tpu.matmul %7, %8, %cst_6 {dimension_numbers = #tpu.dot_dimension_numbers<[1], [0], [0], [1], [0, 0, 1, 1], [], []>} : vector<32x32xbf16>, vector<32x128xbf16>, vector<32x128xf32> -> vector<32x128xf32>
    %10 = vector.extract_strided_slice %3 {offsets = [32, 0], sizes = [32, 128], strides = [1, 1]} : vector<64x128xf32> to vector<32x128xf32>
    %11 = arith.addf %9, %10 : vector<32x128xf32>
    %cst_7 = arith.constant 0.000000e+00 : f32
    %12 = vector.broadcast %cst_7 : f32 to vector<32x128xf32>
    %13 = arith.maximumf %11, %12 : vector<32x128xf32>
    %c0_8 = arith.constant 0 : index
    %c0_9 = arith.constant 0 : index
    %14 = vector.load %arg4[%c0_8, %c0_9] : memref<32x1xf32, #tpu.memory_space<vmem>>, vector<32x1xf32>
    %15 = vector.broadcast %14 : vector<32x1xf32> to vector<32x128xf32>
    %16 = arith.mulf %13, %15 : vector<32x128xf32>
    %cst_10 = arith.constant dense<0.000000e+00> : vector<128xf32>
    %17 = vector.multi_reduction <add>, %16, %cst_10 [0] : vector<32x128xf32> to vector<128xf32>
    %18 = vector.shape_cast %17 : vector<128xf32> to vector<1x128xf32>
    %c0_11 = arith.constant 0 : index
    %c0_12 = arith.constant 0 : index
    %19 = memref.load %arg5[%c0_11, %c0_12] : memref<1x1xf32, #tpu.memory_space<smem>>
    %20 = vector.broadcast %19 : f32 to vector<1x128xf32>
    %21 = arith.addf %18, %20 : vector<1x128xf32>
    %c0_13 = arith.constant 0 : index
    %c0_14 = arith.constant 0 : index
    %22 = vector.load %arg6[%c0_13, %c0_14] : memref<1x128xf32, #tpu.memory_space<vmem>>, vector<1x128xf32>
    tpu.vector_store %arg6[%c0_13, %c0_14], %21 {strides = array<i32>} : memref<1x128xf32, #tpu.memory_space<vmem>>, vector<1x128xf32>,
    return
  }
  func.func @transform_0(%arg0: i32) -> (i32, i32) {
    %c0_i32 = arith.constant 0 : i32
    %c0_i32_0 = arith.constant 0 : i32
    return %c0_i32, %arg0 : i32, i32
  }
  func.func @transform_1(%arg0: i32) -> (i32, i32) {
    %c0_i32 = arith.constant 0 : i32
    %c0_i32_0 = arith.constant 0 : i32
    %c0_i32_1 = arith.constant 0 : i32
    return %c0_i32, %c0_i32_0 : i32, i32
  }
  func.func @transform_2(%arg0: i32) -> (i32, i32) {
    %c0_i32 = arith.constant 0 : i32
    %c0_i32_0 = arith.constant 0 : i32
    %c0_i32_1 = arith.constant 0 : i32
    return %c0_i32, %c0_i32_0 : i32, i32
  }
  func.func @transform_3(%arg0: i32) -> (i32, i32) {
    %c0_i32 = arith.constant 0 : i32
    %c0_i32_0 = arith.constant 0 : i32
    %c0_i32_1 = arith.constant 0 : i32
    return %c0_i32, %c0_i32_0 : i32, i32
  }
  func.func @transform_4(%arg0: i32) -> (i32, i32) {
    %c0_i32 = arith.constant 0 : i32
    %c0_i32_0 = arith.constant 0 : i32
    %c0_i32_1 = arith.constant 0 : i32
    return %c0_i32, %c0_i32_0 : i32, i32
  }
  func.func @transform_5(%arg0: i32) -> (i32, i32) {
    %c0_i32 = arith.constant 0 : i32
    %c0_i32_0 = arith.constant 0 : i32
    return %c0_i32, %arg0 : i32, i32
  }
}

</mosaic_0001>

<bundles_post_ra>
// kernel: tpu_custom_call.1
= control target key start
LH: loop header
LB: loop body
LE: loop exit
PB: predicated region body
PF: predicated region fallthrough
CT: control target
= control target key end

     0   :  { %s1125_s0 = inlined_call_operand.hbm [shape: u8[96,256], index: 0, kind: input, shape index: {}]   ;;  %s1126_s1 = inlined_call_operand.vmem [shape: bf16[64,96], index: 1, kind: input, shape index: {}]   ;;  %s1127_s2 = inlined_call_operand.hbm [shape: bf16[32,32], index: 2, kind: input, shape index: {}]   ;;  %s1128_s3 = inlined_call_operand.vmem [shape: f32[32,1], index: 3, kind: input, shape index: {}]   ;;  %s1129_s4 = inlined_call_operand.<no memory space> [shape: f32[1,1], index: 4, kind: input, shape index: {}]   ;;  %s1130_s5 = inlined_call_operand.hbm [shape: f32[1,256], index: 5, kind: output, shape index: {}]  }
   0x1   :  { %10 = sst [smem:[#allocation2]] %s1129_s4 }
   0x2   :  { %11 = vsyncpa [#allocation4], 0 }
   0x3   :  { %13 = vsyncpa [#allocation4 + $0x1], 0 }
   0x4   :  { %14 = vsyncpa [#allocation7], 0 }
   0x5   :  { %15 = vsyncpa [#allocation5], 0 }
   0x6   :  { %17 = vsyncpa [#allocation5 + $0x1], 0  ;;  %s896_s20 = smov 0   ;;  %s898_s21 = smov 0  }
   0x7   :  { %s900_s22 = smov 0   ;;  %s902_s23 = smov 0  }
   0x8 LB: > { %s917_s4 = sadd.s32 4294967295, %s852_s23   ;;  %s583_s24 = sadd.s32 4294967294, %s852_s23   ;;  %s852_s23 = sphi %s902_s23, %s1154_s23   ;;  %s848_s22 = sphi %s900_s22, %s1153_s22   ;;  %s844_s21 = sphi %s898_s21, %s1152_s21   ;;  %s840_s20 = sphi %s896_s20, %s1151_s20  }
   0x9   : > { %s921_s25 = sadd.s32 1, %s852_s23   ;;  %s30_s26 = sadd.s32 1, %s848_s22 }
   0xa   : > { %s27_s27 = ssub.s32 %s852_s23, %s921_s25  ;;  %p37_p0 = scmp.ne.s32.totalorder %s848_s22, %s844_s21 }
   0xb   : > { %p28_p1 = scmp.eq.s32.totalorder %s27_s27, 0  ;;  %p38_p2 = scmp.eq.s32.totalorder %s852_s23, 0 }
   0xc   : > { %p43_p3 = scmp.ne.s32.totalorder %s844_s21, %s840_s20  ;;  %p1131_p4 = scmp.eq.s32.totalorder %s917_s4, 0 }
   0xd   : > { %s933_s28 = scalar_select %p28_p1, %s848_s22, %s30_s26  }
   0xe   : > { %p935_p5 = por %p38_p2, %p37_p0  ;;  %p941_p6 = por %p1131_p4, %p43_p3 }
   0xf   : > { %p151_p7 = scmp.eq.s32.totalorder %s917_s4, 1  ;;  %p157_p8 = scmp.eq.s32.totalorder %s583_s24, 1 }
  0x10   : > { %s1135_s29 = scalar_select %p935_p5, 1, 0 }
  0x11   : > { %s1136_s30 = scalar_select %p941_p6, 1, 0 }
  0x12   : > { %p584_p9 = scmp.ge.s32.totalorder %s852_s23, 1  ;;  %p164_p10 = scmp.lt.s32.totalorder %s852_s23, 3 }
  0x13   : > { %p948_p11 = por %p151_p7, %p37_p0  ;;  %p952_p12 = por %p157_p8, %p43_p3 }
  0x14   : > { %p956_p13 = pnand %p584_p9, %p164_p10  ;;  %s854_s9 = smov [#allocation6]  }
  0x15   : > { %s1137_s6 = scalar_select %p948_p11, 1, 0 }
  0x16   : > { %s1138_s7 = scalar_select %p952_p12, 1, 0 }
  0x17   : > { %s1139_s8 = scalar_select %p956_p13, 1, 0 }
  0x18   : > { %p661_p1 = pneg %p956_p13  ;;  %s179_s10 = sshll.u32 %s854_s9, 4  ;;  %s180_s10 = int_to_ptr.vmem [resolvable:$true] %s179_s10 }
  0x19   : > { %s199_s12 = sand.u32 1, %s848_s22   ;;  %s724_s15 = scalar_lea.hbm %s1127_s2, 256 }
  0x1a   : > { %p964_p2 = pnand %p661_p1, %p1131_p4  ;;  %p725_p7 = scmp.ne.s32.totalorder %s1127_s2, %s724_s15 }
  0x1b   : > { %p731_p1 = scmp.lt.u32.totalorder %s724_s15, %s1127_s2 }
  0x1c   : > { %p726_p8 = pneg %p964_p2 }
  0x1e   : > { %p727_p9 = pnand %p726_p8, %p725_p7 }
  0x20   : > { %p728_p10 = pneg %p727_p9 }
  0x22   : > { %p733_p4 = pnand %p731_p1, %p728_p10 }
  0x24   : > { %736 = shalt.err (!%p733_p4)
}
  0x25   : > { %s737_s24 = scalar_lea.vmem %s180_s10, 256  ;;  %p745_p11 = scmp.lt.s32.totalorder %s180_s10, %s180_s10 }
  0x26   : > { %p738_p0 = scmp.ne.s32.totalorder %s180_s10, %s737_s24  ;;  %p746_p6 = scmp.lt.s32.totalorder %s737_s24, %s737_s24 }
  0x28   : > { %p740_p3 = pnand %p738_p0, %p726_p8  ;;  %p747_p13 = por %p746_p6, %p745_p11 }
  0x2a   : > { %p741_p12 = pneg %p740_p3 }
  0x2c   : > { %p748_p5 = pnand %p747_p13, %p741_p12 }
  0x2e   : > { %751 = shalt.err (!%p748_p5)
}
  0x2f   : > { %s855_s26 = smov 64   ;;  %s856_s27 = smov 4  }
  0x30   : > { %664 = dma.hbm_to_vmem [thread:$0]  (!%p964_p2), %s1127_s2, 256, %s180_s10, [#allocation7], %s855_s26, %s855_s26, %s856_s27  }
  0x31   : > { %p1141_p4 = scmp.ne.s32.totalorder %s1135_s29, 0  ;;  %p1142_p7 = scmp.lt.s32.totalorder %s852_s23, 2 }
  0x32   : > { %s651_s15 = smul.u32 24, %s199_s12  ;;  %s587_s16 = sshll.u32 %s852_s23, 7 }
  0x33   : > { %p991_p0 = pnand %p1142_p7, %p1141_p4  ;;  %s999_s19 = scalar_lea.hbm %s1125_s0, %s587_s16 }
  0x34   : > { %s203_s10 = scalar_lea.vmem [#allocation3], %s651_s15  ;;  %s1003_s11 = scalar_lea.sflag [#allocation4], %s199_s12 }
  0x35   : > { %s209_s29 = sshll.u32 %s203_s10, 4  ;;  %s752_s24 = scalar_lea.hbm %s999_s19, 384  ;;  %s1001_s29 = int_to_ptr.vmem [resolvable:$true] %s209_s29 }
  0x36   : > { %p753_p5 = scmp.ne.s32.totalorder %s999_s19, %s752_s24  ;;  %p754_p6 = pneg %p991_p0 }
  0x37   : > { %s757_s9 = scalar_lea.hbm %s1125_s0, 768  ;;  %p758_p13 = scmp.lt.u32.totalorder %s999_s19, %s1125_s0 }
  0x38   : > { %p755_p11 = pnand %p754_p6, %p753_p5  ;;  %p759_p2 = scmp.lt.u32.totalorder %s757_s9, %s752_s24 }
  0x39   : > { %p761_p8 = scmp.lt.u32.totalorder %s752_s24, %s999_s19 }
  0x3a   : > { %p756_p12 = pneg %p755_p11  ;;  %p760_p3 = por %p759_p2, %p758_p13 }
  0x3c   : > { %p762_p9 = por %p761_p8, %p760_p3 }
  0x3e   : > { %p763_p10 = pnand %p762_p9, %p756_p12 }
  0x40   : > { %766 = shalt.err (!%p763_p10)
}
  0x41   : > { %s767_s12 = scalar_lea.vmem %s1001_s29, 384  ;;  %s857_s15 = smov [#allocation3]  }
  0x42   : > { %p768_p1 = scmp.ne.s32.totalorder %s1001_s29, %s767_s12  ;;  %s772_s17 = sshll.u32 %s857_s15, 4  ;;  %s773_s17 = int_to_ptr.vmem [resolvable:$false] %s772_s17 }
  0x43   : > { %s774_s18 = scalar_lea.vmem %s773_s17, 768  ;;  %p775_p5 = scmp.lt.s32.totalorder %s1001_s29, %s773_s17 }
  0x44   : > { %p770_p4 = pnand %p768_p1, %p754_p6  ;;  %p776_p11 = scmp.lt.s32.totalorder %s774_s18, %s767_s12 }
  0x46   : > { %p771_p7 = pneg %p770_p4  ;;  %p777_p13 = por %p776_p11, %p775_p5 }
  0x48   : > { %p778_p2 = pnand %p777_p13, %p771_p7 }
  0x4a   : > { %781 = shalt.err (!%p778_p2)
}
  0x4b   : > { %s858_s10 = smov 256   ;;  %s859_s24 = smov 128  }
  0x4c   : > { %s860_s26 = smov 8   ;;  %p1144_p6 = scmp.ne.s32.totalorder %s1139_s8, 0 }
  0x4d   : > { %668 = dma.hbm_to_vmem [thread:$0]  (!%p991_p0), %s999_s19, 384, %s1001_s29, %s1003_s11, %s858_s10, %s859_s24, %s860_s26  }
  0x4e   : > { %221 = sbr.rel (%p1144_p6) target bundleno = 598 (0x256), region = 40  ;;  %s1034_s27 = sand.u32 (!%p1144_p6), 1, %s844_s21  }
  0x4f   : > { %s652_s9 = smul.u32 (!%p1144_p6), 24, %s1034_s27  ;;  %s224_s13 = scalar_lea.sflag (!%p1144_p6), [#allocation4], %s1034_s27 }
  0x50   : > { %p1145_p12 = scmp.ne.s32.totalorder (!%p1144_p6), %s1136_s30, 0 }
  0x51   : > { %s227_s16 = scalar_lea.vmem (!%p1144_p6), [#allocation3], %s652_s9 }
  0x55   : > { %827 = dma.done.wait (%p1145_p12), %s224_s13, 384  }
  0x56   : > { %829 = vsyncadd (%p1145_p12), %s224_s13, 4294966912  ;;  %p1146_p3 = scmp.eq.s32.totalorder %s917_s4, 0 }
  0x58   : > { %831 = dma.done.wait (%p1146_p3), [#allocation7], 256   ;;  %p1147_p0 = pmov %p1146_p3 }
  0x59   : > { %v258_v0 = vld [vmem:[%s227_s16] sm:$0xff]  ;;  %vm295_vm0 = vcmask 785408   ;;  %v259_v4 = vld [vmem:[%s227_s16 + $0x8] sm:$0xff]  ;;  %v260_v7 = vld [vmem:[%s227_s16 + $0x10] sm:$0xff]  ;;  %vm393_vm1 = vcmask 261120   ;;  %v861_v16 = vmov 0  }
  0x5a   : > { %833 = vsyncadd (%p1147_p0), [#allocation7], 4294967040  ;;  %v261_v1 = vunpack.c.l.u8.bf16 %v258_v0  ;;  %v262_v2 = vunpack.c.h.u8.bf16 %v258_v0  ;;  %v718_v3 = vld [vmem:[%s1126_s1] sm:$0xff]   ;;  %v263_v5 = vunpack.c.l.u8.bf16 %v259_v4  ;;  %v264_v6 = vunpack.c.h.u8.bf16 %v259_v4  ;;  %v719_v10 = vld [vmem:[%s1126_s1 + $0x8] sm:$0xff]   ;;  %716 = vset.pattern.permute.xlu0 %v861_v16  ;;  %717 = vset.pattern.permute.xlu1 %v861_v16  ;;  %s490_s8 = sld [smem:[#allocation2]]  ;;  %s602_s14 = sshll.u32 %s917_s4, 4 }
  0x5b   : > { %631 = vmatprep.mubr.msk.bf16.mxu1 %vm295_vm0, %v718_v3  ;;  %v265_v8 = vunpack.c.l.u8.bf16 %v260_v7  ;;  %v266_v9 = vunpack.c.h.u8.bf16 %v260_v7  ;;  %v720_v11 = vld [vmem:[%s1126_s1 + $0x10] sm:$0xff]   ;;  %v721_v12 = vld [vmem:[%s1126_s1 + $0x18] sm:$0xff]   ;;  %v453_v14 = vld [vmem:[%s1128_s3] sm:$0xff]  ;;  %s256_s30 = scalar_lea.vmem [#allocation8], %s1034_s27  ;;  %s1081_s12 = scalar_lea.hbm %s1130_s5, %s602_s14 }
  0x5c   : > { %619 = vmatprep.subr.bf16.mxu1 %v261_v1  ;;  %v722_v13 = vld [vmem:[#allocation6] sm:$0xff]   ;;  %459 = vperm.xlu0 %716, %v453_v14   ;;  %v454_v17 = vld [vmem:[%s1128_s3 + $0x8] sm:$0xff]  ;;  %v456_v18 = vld [vmem:[%s1128_s3 + $0x18] sm:$0xff]  ;;  %s507_s19 = sshll.u32 %s256_s30, 4  ;;  %s495_s15 = scalar_lea.sflag [#allocation5], %s1034_s27  ;;  %s1083_s19 = int_to_ptr.vmem [resolvable:$true] %s507_s19 }
  0x5d   : > { %620 = vmatpush3.bf16.msra.mxu1 %v261_v1  ;;  %643 = vmatprep.mubr.msk.bf16.mxu0 %vm393_vm1, %v722_v13  ;;  %v455_v15 = vld [vmem:[%s1128_s3 + $0x10] sm:$0xff]  ;;  %v723_v29 = vld [vmem:[#allocation6 + $0x8] sm:$0xff]   ;;  %s782_s17 = scalar_lea.vmem %s1083_s19, 16  ;;  %p1148_p9 = scmp.ne.s32.totalorder %s1137_s6, 0 }
  0x5e   : > { %621 = vmatprep.subr.bf16.mxu1 %v262_v2  ;;  %469 = vperm.xlu1 %717, %v455_v15   ;;  %p783_p8 = scmp.ne.s32.totalorder %s1083_s19, %s782_s17  ;;  %s862_s4 = smov [#allocation8]  }
  0x5f   : > { %s786_s18 = sshll.u32 %s862_s4, 4  ;;  %s787_s18 = int_to_ptr.vmem [resolvable:$false] %s786_s18 }
  0x60   : > { %464 = vperm.xlu0 %716, %v454_v17   ;;  %v491_v62 = vstv %s490_s8  ;;  %p784_p10 = pnand %p783_p8, %p1148_p9  ;;  %s788_s10 = scalar_lea.vmem %s787_s18, 32 }
  0x61   : > { %622 = vmatpush3.bf16.msra.mxu1 %v262_v2  ;;  %p789_p4 = scmp.lt.s32.totalorder %s1083_s19, %s787_s18  ;;  %p790_p7 = scmp.lt.s32.totalorder %s788_s10, %s782_s17 }
  0x62   : > { %623 = vmatprep.subr.bf16.mxu1 %v263_v5  ;;  %474 = vperm.xlu1 %717, %v456_v18   ;;  %p785_p1 = pneg %p784_p10 }
  0x63   : > { %p791_p5 = por %p790_p7, %p789_p4 }
  0x65   : > { %624 = vmatpush3.bf16.msra.mxu1 %v263_v5  ;;  %p792_p11 = pnand %p791_p5, %p785_p1 }
  0x66   : > { %625 = vmatprep.subr.bf16.mxu1 %v264_v6 }
  0x69   : > { %626 = vmatpush3.bf16.msra.mxu1 %v264_v6 }
  0x6a   : > { %627 = vmatprep.subr.bf16.mxu1 %v265_v8 }
  0x6d   : > { %628 = vmatpush3.bf16.msra.mxu1 %v265_v8 }
  0x6e   : > { %629 = vmatprep.subr.bf16.mxu1 %v266_v9 }
  0x71   : > { %630 = vmatpush3.bf16.msra.mxu1 %v266_v9 }
  0x74   : > { %632 = vmatmul.mubr.msk.bf16.vlgmr.msra.gmra.mrb[0].mxu1 %vm295_vm0, %v719_v10 }
  0x75   : > { %635 = vmatprep.mubr.msk.bf16.mxu1 %vm295_vm0, %v720_v11 }
  0x7c   : > { %636 = vmatmul.mubr.msk.bf16.gmra.mrb[4].mxu1 %vm295_vm0, %v721_v12 }
  0xdb   : > { %v460_v35 = vpop.permute.xlu0 %459 }
  0xdd   : > { %v470_v40 = vpop.permute.xlu1 %469 }
  0xdf   : > { %v465_v47 = vpop.permute.xlu0 %464 }
  0xe1   : > { %v475_v51 = vpop.permute.xlu1 %474 }
 0x147   : > { %v633_v19 = vpop.f32.mrb[0].mxu1 }
 0x148   : > { %v342_v20 = vpop.f32.mrb[1].mxu1  ;;  %v375_v22 = vmax.f32 %v633_v19, 0.0 }
 0x149   : > { %v634_v21 = vpop.f32.mrb[2].mxu1  ;;  %v373_v25 = vmax.f32 %v342_v20, 0.0 }
 0x14a   : > { %v376_v23 = vmax.f32 %v634_v21, 0.0  ;;  %v345_v24 = vpop.f32.mrb[3].mxu1 }
 0x14b   : > { %v374_v26 = vmax.f32 %v345_v24, 0.0 }
 0x14c   : > { %v382_v27 = vpack.c.bf16 %v376_v23, %v375_v22 }
 0x14d   : > { %v381_v28 = vpack.c.bf16 %v374_v26, %v373_v25 }
 0x14f   : > { %639 = vmatprep.subr.bf16.mxu0 %v381_v28  ;;  %v637_v30 = vpop.f32.mrb[4].mxu1 }
 0x150   : > { %640 = vmatpush3.bf16.msra.mxu0 %v381_v28  ;;  %v358_v31 = vpop.f32.mrb[5].mxu1 }
 0x151   : > { %641 = vmatprep.subr.bf16.mxu0 %v382_v27  ;;  %v638_v32 = vpop.f32.mrb[6].mxu1 }
 0x152   : > { %v361_v33 = vpop.f32.mrb[7].mxu1 }
 0x154   : > { %642 = vmatpush3.bf16.msra.mxu0 %v382_v27 }
 0x157   : > { %644 = vmatmul.mubr.msk.bf16.vlgmr.msra.gmra.mrb[0].mxu0 %vm393_vm1, %v723_v29 }
 0x22a   : > { %v645_v34 = vpop.f32.mrb[0].mxu0 }
 0x22b   : > { %v443_v36 = vadd.f32 %v645_v34, %v637_v30  ;;  %v434_v37 = vpop.f32.mrb[1].mxu0 }
 0x22c   : > { %v435_v38 = vadd.f32 %v434_v37, %v358_v31  ;;  %v646_v39 = vpop.f32.mrb[2].mxu0 }
 0x22d   : > { %v446_v41 = vadd.f32 %v646_v39, %v638_v32  ;;  %v437_v42 = vpop.f32.mrb[3].mxu0  ;;  %v451_v45 = vmax.f32 %v443_v36, 0.0 }
 0x22e   : > { %v449_v43 = vmax.f32 %v435_v38, 0.0  ;;  %v438_v44 = vadd.f32 %v437_v42, %v361_v33 }
 0x22f   : > { %v452_v49 = vmax.f32 %v446_v41, 0.0  ;;  %v479_v52 = vmul.f32 %v470_v40, %v451_v45 }
 0x230   : > { %v450_v46 = vmax.f32 %v438_v44, 0.0  ;;  %v477_v48 = vmul.f32 %v460_v35, %v449_v43 }
 0x231   : > { %v480_v54 = vmul.f32 %v475_v51, %v452_v49 }
 0x232   : > { %v478_v50 = vmul.f32 %v465_v47, %v450_v46 }
 0x234   : > { %v481_v53 = vadd.f32 %v478_v50, %v477_v48 }
 0x236   : > { %v482_v55 = vadd.f32 %v481_v53, %v479_v52 }
 0x238   : > { %v483_v56 = vadd.f32 %v482_v55, %v480_v54 }
 0x23a   : > { %v484_v57 = vrot.slane %v483_v56, 4 }
 0x23c   : > { %v485_v58 = vadd.f32 %v484_v57, %v483_v56 }
 0x23e   : > { %v486_v59 = vrot.slane %v485_v58, 2 }
 0x240   : > { %v487_v60 = vadd.f32 %v486_v59, %v485_v58 }
 0x242   : > { %v488_v61 = vrot.slane %v487_v60, 1 }
 0x244   : > { %v489_v63 = vadd.f32 %v488_v61, %v487_v60 }
 0x246   : > { %v492_v0 = vadd.f32 %v491_v62, %v489_v63 }
 0x248   : > { %493 = vst [vmem:[%s256_s30] sm:$0x1] %v492_v0 }
 0x249   : > { %795 = shalt.err (!%p792_p11)
}
 0x24a   : > { %s796_s27 = scalar_lea.hbm %s1081_s12, 16  ;;  %s800_s9 = scalar_lea.hbm %s1130_s5, 32 }
 0x24b   : > { %p797_p13 = scmp.ne.s32.totalorder %s1081_s12, %s796_s27  ;;  %p801_p12 = scmp.lt.u32.totalorder %s1081_s12, %s1130_s5 }
 0x24c   : > { %p802_p3 = scmp.lt.u32.totalorder %s800_s9, %s796_s27  ;;  %p804_p8 = scmp.lt.u32.totalorder %s796_s27, %s1081_s12 }
 0x24d   : > { %p798_p2 = pnand %p797_p13, %p1148_p9 }
 0x24e   : > { %p803_p0 = por %p802_p3, %p801_p12 }
 0x24f   : > { %p799_p6 = pneg %p798_p2 }
 0x250   : > { %p805_p10 = por %p804_p8, %p803_p0 }
 0x252   : > { %p806_p1 = pnand %p805_p10, %p799_p6 }
 0x254   : > { %809 = shalt.err (!%p806_p1)
}
 0x255   : > { %659 = dma.vmem_to_hbm [thread:$0]  (%p1148_p9), %s1083_s19, 16, %s1081_s12, %s495_s15  }
 0x256 PF: > { %s519_s8 = sand.u32 1, %s840_s20   ;;  %p1149_p4 = scmp.ne.s32.totalorder %s1138_s7, 0 }
 0x257   : > { %p1150_p7 = scmp.ge.s32.totalorder %s852_s23, 2  ;;  %s520_s14 = scalar_lea.sflag [#allocation5], %s519_s8 }
 0x259   : > { %p670_p5 = pnand %p1150_p7, %p1149_p4 }
 0x25b   : > { %835 = dma.done.wait (!%p670_p5), %s520_s14, 16  }
 0x25c   : > { %837 = vsyncadd (!%p670_p5), %s520_s14, 4294967280  ;;  %p20_p11 = scmp.ge.s32.totalorder %s921_s25, 4   ;;  %s1151_s20 = smov %s844_s21 }
 0x25d   : > { %s1152_s21 = smov %s848_s22  ;;  %s1153_s22 = smov %s933_s28 }
 0x25e   : > { %s1154_s23 = smov %s921_s25  ;;  %22 = sbr.rel (!%p20_p11) target bundleno = 8 (0x8), region = 89 }
 0x265   :  { %524 = vsyncpa [#allocation4], 1 }
 0x266   :  { %526 = vsyncpa [#allocation4 + $0x1], 1 }
 0x267   :  { %527 = vsyncpa [#allocation7], 1 }
 0x268   :  { %528 = vsyncpa [#allocation5], 1 }
 0x269   :  { %530 = vsyncpa [#allocation5 + $0x1], 1 }

</bundles_post_ra>
